<compile_context>
chip_gen: v7x
topology: tpu7x:2x2x1
jax: 0.10.0
libtpu: 0.0.40
codegen_flags: <defaults>
</compile_context>

<pallas_src>
import math
import functools

import jax
import jax.numpy as jnp
from jax import lax
from jax.experimental import pallas as pl
from jax.experimental.pallas import tpu as pltpu


def _round_up(x, m):
    return ((x + m - 1) // m) * m


def _vmem_capacity_bytes():
    try:
        return int(pltpu.get_tpu_info().vmem_capacity_bytes)
    except Exception:
        return 64 << 20  # conservative (v7x per-TC VMEM)


def _is_v5e():
    try:
        kind = jax.devices()[0].device_kind.lower()
    except Exception:
        return False
    return ("v5" in kind) and ("lite" in kind or "v5e" in kind)


# ----------------------------- Pallas kernel --------------------------------
def _conv_same_kernel(xa_ref, xb_ref, w_ref, b_ref, o_ref, *, taps, rt, wout, kpad):
    """One (batch, row-tile, Cout-tile) grid step.

    xa_ref: (P, 1, RT, Wq, Cin)  row slab of the stride-phase split input (bf16)
    xb_ref: (P, 1, HB, Wq, Cin)  halo rows just below the slab
    w_ref : (Kp, TN)             fused im2col weights (tap-major K, zero padded)
    b_ref : (1, TN)              bias (f32)
    o_ref : (1, RT, Wout, TN)    output tile
    taps  : static tuple of (phase index, row offset, col offset) per (kh, kw)
    """
    cin = xa_ref.shape[-1]
    tn = o_ref.shape[-1]
    m = rt * wout

    # Stitch the row slab and its halo into one (P, RT+HB, Wq, Cin) window.
    x = jnp.concatenate([xa_ref[...], xb_ref[...]], axis=2)[:, 0]

    # Fused in-VMEM im2col: all taps packed along K (tap-major, Cin contiguous),
    # zero-padded so the LHS minor dim is a lane-dense multiple of 128.
    parts = [x[p, qh:qh + rt, qw:qw + wout, :].reshape(m, cin)
             for (p, qh, qw) in taps]
    if kpad:
        parts.append(jnp.zeros((m, kpad), x.dtype))
    lhs = jnp.concatenate(parts, axis=-1)                      # (M, Kp)

    # Single deep-K MXU matmul with f32 accumulation (no K-loop, no spilled acc).
    acc = jnp.dot(lhs, w_ref[...], preferred_element_type=jnp.float32)
    acc = acc + b_ref[...].astype(jnp.float32)
    o_ref[...] = acc.reshape(1, rt, wout, tn).astype(o_ref.dtype)


def _conv_same_pallas(phases, w_fused, bias2d, *, taps, rt, hb, hout_pad, wout,
                      tn, kpad, out_dtype):
    """phases: (P, N, Hq_pad, Wq, Cin) bf16; w_fused: (Kp, Cop) bf16;
    bias2d: (1, Cop) f32  ->  (N, Hout_pad, Wout, Cop) out_dtype."""
    P, N, Hq_pad, Wq, Cin = phases.shape
    Kp, Cop = w_fused.shape
    assert Cop % tn == 0 and hout_pad % rt == 0 and rt % hb == 0
    R = hout_pad // rt
    J = Cop // tn
    grid = (N, R, J)
    rt_blocks = rt // hb

    out_isz = jnp.dtype(out_dtype).itemsize
    m = rt * wout
    # Rough per-step VMEM footprint (double-buffered blocks + in-kernel temporaries).
    est = (3 * P * (rt + hb) * Wq * Cin * 2        # x row blocks (2-buf) + stitched copy
           + 2 * Kp * tn * 2 + 2 * tn * 4          # weights + bias (2-buf)
           + m * Kp * 2                            # im2col LHS (bf16)
           + m * tn * 4                            # f32 matmul result
           + 2 * m * tn * out_isz)                 # output blocks (2-buf)
    cap = _vmem_capacity_bytes()
    vmem_limit = None
    if est > (12 << 20):
        vmem_limit = int(min(max(2 * est, 32 << 20), int(0.85 * cap)))

    kernel = functools.partial(_conv_same_kernel, taps=tuple(taps), rt=rt,
                               wout=wout, kpad=kpad)

    cost = pl.CostEstimate(
        flops=2 * N * hout_pad * wout * Kp * Cop,
        transcendentals=0,
        bytes_accessed=(N * R * P * (rt + hb) * Wq * Cin * 2      # activations (+halo)
                        + N * R * J * (Kp * tn * 2 + tn * 4)      # weights re-fetched per (n, r)
                        + N * hout_pad * wout * Cop * out_isz))   # output writeback

    return pl.pallas_call(
        kernel,
        out_shape=jax.ShapeDtypeStruct((N, hout_pad, wout, Cop), out_dtype),
        grid_spec=pltpu.PrefetchScalarGridSpec(
            num_scalar_prefetch=0,
            grid=grid,
            in_specs=[
                # Row slab of all stride phases for batch n (constant across j -> resident).
                pl.BlockSpec((P, 1, rt, Wq, Cin), lambda n, r, j: (0, n, r, 0, 0)),
                # Halo rows just below the slab (block units of hb rows; hb | rt).
                pl.BlockSpec((P, 1, hb, Wq, Cin),
                             lambda n, r, j: (0, n, (r + 1) * rt_blocks, 0, 0)),
                pl.BlockSpec((Kp, tn), lambda n, r, j: (0, j)),
                pl.BlockSpec((1, tn), lambda n, r, j: (0, j)),
            ],
            out_specs=pl.BlockSpec((1, rt, wout, tn), lambda n, r, j: (n, r, 0, j)),
        ),
        compiler_params=pltpu.CompilerParams(
            # Batch first: a dual-TC (v7x) split over n keeps activation DMAs disjoint;
            # Cout tiles innermost so the activation slab stays resident across them.
            dimension_semantics=("parallel", "parallel", "arbitrary"),
            vmem_limit_bytes=vmem_limit),
        cost_estimate=cost,
    )(phases, phases, w_fused, bias2d)


# --------------------------- Module equivalent -------------------------------
class Conv2dStaticSamePadding:
    """JAX/Pallas port of the PyTorch Conv2dStaticSamePadding module (groups=1)."""

    def __init__(self, in_channels, out_channels, kernel_size, stride=1,
                 bias=True, groups=1, dilation=1, *, key=None,
                 dtype=jnp.float32, compute_dtype=jnp.bfloat16):
        # TODO(synk): groups != 1 and dilation != 1 are not implemented.
        assert groups == 1, "groups != 1 not implemented"
        assert dilation in (1, (1, 1), [1, 1]), "dilation != 1 not implemented"
        if isinstance(kernel_size, int):
            kernel_size = [kernel_size] * 2
        elif len(kernel_size) == 1:
            kernel_size = [kernel_size[0]] * 2
        if isinstance(stride, int):
            stride = [stride] * 2
        elif len(stride) == 1:
            stride = [stride[0]] * 2
        self.kernel_size = tuple(kernel_size)
        self.stride = tuple(stride)
        self.in_channels = in_channels
        self.out_channels = out_channels
        self.use_bias = bias
        self.compute_dtype = compute_dtype

        # Deterministic parameter init (mimics nn.Conv2d's uniform init bounds).
        if key is None:
            key = jax.random.PRNGKey(0)
        kw_key, kb_key = jax.random.split(key)
        fan_in = in_channels * self.kernel_size[0] * self.kernel_size[1]
        bound = 1.0 / math.sqrt(fan_in)
        self.weight = jax.random.uniform(
            kw_key, (out_channels, in_channels, *self.kernel_size),
            minval=-bound, maxval=bound, dtype=dtype)
        if bias:
            self.bias = jax.random.uniform(
                kb_key, (out_channels,), minval=-bound, maxval=bound, dtype=dtype)
        else:
            self.bias = jnp.zeros((out_channels,), dtype=dtype)

    def __call__(self, x):
        # x: (N, Cin, H, W) -- matches the PyTorch module's NCHW convention.
        N, Cin, H, W = x.shape
        KH, KW = self.kernel_size
        sh, sw = self.stride
        Cout = self.out_channels
        P = sh * sw

        # TF-SAME padding math (identical to the PyTorch forward; negative values crop,
        # exactly matching F.pad semantics).
        Hout = math.ceil(H / sh)
        Wout = math.ceil(W / sw)
        extra_h = (Wout - 1) * sw - W + KW
        extra_v = (Hout - 1) * sh - H + KH
        left = extra_h // 2
        right = extra_h - left
        top = extra_v // 2
        bottom = extra_v - top

        max_qh = (KH - 1) // sh
        max_qw = (KW - 1) // sw
        Wq_pad = Wout + max_qw                 # phase columns (ceil((W+left+right)/sw))

        # Fused-K im2col sizes.
        T = KH * KW
        K = T * Cin
        Kp = _round_up(K, 128)

        # Cout tiling: lane-dense tiles when Cout % 128 == 0, otherwise one full-extent
        # tile (no channel padding -> no write amplification, no post-slice pass).
        if Cout % 128 == 0:
            tn = 256 if (Cout % 256 == 0 and not _is_v5e()) else 128
        else:
            tn = Cout
        out_dtype = self.weight.dtype
        out_isz = jnp.dtype(out_dtype).itemsize

        # ---- output-row tiling (bounds per-step VMEM; v7x = 64 MiB) ----
        def step_bytes(rt_):
            m_ = rt_ * Wout
            return (3 * P * (rt_ + max(max_qh, 1)) * Wq_pad * Cin * 2
                    + 2 * Kp * tn * 2 + 2 * tn * 4
                    + m_ * Kp * 2 + m_ * tn * 4 + 2 * m_ * tn * out_isz)

        rt = 32
        while rt > 8 and step_bytes(rt) > (16 << 20):
            rt //= 2
        R = -(-Hout // rt)
        rt = -(-Hout // R)                    # rebalance -> minimal row padding
        rt = max(rt, max_qh, 1)
        R = -(-Hout // rt)
        hout_pad = R * rt
        # Halo block: the smallest divisor of rt covering max_qh rows (>= 1).
        hb = next(d for d in range(max(max_qh, 1), rt + 1) if rt % d == 0)

        Hq_pad = hout_pad + hb                # phase rows incl. halo / row padding
        Hp_pad = Hq_pad * sh
        Wp_pad = Wq_pad * sw
        pad_bottom = Hp_pad - H - top
        pad_right = Wp_pad - W - left

        # bf16 activations (f32 accumulation happens inside the kernel).
        xc = x.astype(self.compute_dtype)
        x_nhwc = jnp.transpose(xc, (0, 2, 3, 1))
        x_p = lax.pad(x_nhwc, jnp.asarray(0, x_nhwc.dtype),
                      ((0, 0, 0),
                       (top, pad_bottom, 0),
                       (left, pad_right, 0),
                       (0, 0, 0)))

        # Stride-phase split (skipped when stride == 1): one cheap XLA pass over 1x the
        # activation data; every slice inside the kernel becomes static and unit-stride.
        if sh == 1 and sw == 1:
            phases = x_p[None]                               # (1, N, Hq, Wq, Cin)
        else:
            x6 = x_p.reshape(N, Hq_pad, sh, Wq_pad, sw, Cin)
            phases = jnp.transpose(x6, (2, 4, 0, 1, 3, 5)).reshape(P, N, Hq_pad, Wq_pad, Cin)

        # Static per-tap metadata: (phase index, row offset, col offset).
        taps = tuple(((kh % sh) * sw + (kw % sw), kh // sh, kw // sw)
                     for kh in range(KH) for kw in range(KW))

        # Fused im2col weights: (Cout, Cin, KH, KW) -> (KH*KW*Cin, Cout) tap-major,
        # K zero-padded to Kp so the in-kernel LHS is lane-dense.
        w_fused = jnp.transpose(self.weight, (2, 3, 1, 0)).reshape(K, Cout)
        if Kp != K:
            w_fused = jnp.pad(w_fused, ((0, Kp - K), (0, 0)))
        w_fused = w_fused.astype(self.compute_dtype)
        bias2d = self.bias.reshape(1, Cout).astype(jnp.float32)

        out = _conv_same_pallas(phases, w_fused, bias2d, taps=taps, rt=rt, hb=hb,
                                hout_pad=hout_pad, wout=Wout, tn=tn, kpad=Kp - K,
                                out_dtype=out_dtype)        # (N, Hout_pad, Wout, Cout)
        if hout_pad != Hout:
            out = out[:, :Hout]
        # NHWC -> NCHW to match the PyTorch module's output convention.
        return jnp.transpose(out, (0, 3, 1, 2))


# ------------------------------ reference ------------------------------------
def _reference_conv_same(x, weight, bias, stride, kernel_size, compute_dtype):
    """Pure-JAX reference (same SAME-padding math, bf16 inputs, f32 accumulation)."""
    N, Cin, H, W = x.shape
    KH, KW = kernel_size
    sh, sw = stride
    Hout = math.ceil(H / sh)
    Wout = math.ceil(W / sw)
    extra_h = (Wout - 1) * sw - W + KW
    extra_v = (Hout - 1) * sh - H + KH
    left = extra_h // 2
    right = extra_h - left
    top = extra_v // 2
    bottom = extra_v - top
    xp = lax.pad(x.astype(compute_dtype), jnp.asarray(0, compute_dtype),
                 ((0, 0, 0), (0, 0, 0), (top, bottom, 0), (left, right, 0)))
    y = lax.conv_general_dilated(
        xp, weight.astype(compute_dtype), window_strides=(sh, sw), padding="VALID",
        dimension_numbers=("NCHW", "OIHW", "NCHW"),
        preferred_element_type=jnp.float32)
    return y + bias.reshape(1, -1, 1, 1).astype(jnp.float32)


# --------------------------------- main ---------------------------------------
if __name__ == "__main__":
    key = jax.random.PRNGKey(0)
    k_x, k_p = jax.random.split(key)

    # Small shapes: batch=2, in_channels=4, out_channels=8, spatial=16x16,
    # kernel=3, stride=2 (so SAME padding is actually exercised).
    N, Cin, H, W = 2, 4, 16, 16
    Cout, Ksz, S = 8, 3, 2

    x = jax.random.normal(k_x, (N, Cin, H, W), dtype=jnp.float32)

    conv = Conv2dStaticSamePadding(Cin, Cout, Ksz, stride=S, bias=True, key=k_p)

    fwd = jax.jit(lambda inp: conv(inp))
    y = jax.block_until_ready(fwd(x))

    # Sanity check against a pure-JAX reference using the same bf16 inputs.
    y_ref = _reference_conv_same(x, conv.weight, conv.bias,
                                 conv.stride, conv.kernel_size, conv.compute_dtype)
    assert y.shape == (N, Cout, math.ceil(H / S), math.ceil(W / S)), y.shape
    max_err = float(jnp.max(jnp.abs(y - y_ref)))
    assert jnp.allclose(y, y_ref, rtol=1e-2, atol=1e-2), max_err

    print("KERNEL_OK")
</pallas_src>

<mosaic_0001>
module attributes {stable_mosaic.version = 11 : i64} {
  func.func @_conv_same_kernel(%arg0: i32, %arg1: i32, %arg2: i32, %arg3: memref<4x1x8x9x4xbf16, #tpu.memory_space<vmem>>, %arg4: memref<4x1x1x9x4xbf16, #tpu.memory_space<vmem>>, %arg5: memref<128x8xbf16, #tpu.memory_space<vmem>>, %arg6: memref<1x8xf32, #tpu.memory_space<vmem>>, %arg7: memref<1x8x8x8xf32, #tpu.memory_space<vmem>>) attributes {dimension_semantics = [#tpu.dimension_semantics<parallel>, #tpu.dimension_semantics<parallel>, #tpu.dimension_semantics<arbitrary>], iteration_bounds = array<i64: 2, 1, 1>, scalar_prefetch = 0 : i64, scratch_operands = 0 : i64, tpu.core_type = #tpu.core_type<tc>, window_params = [{transform_indices = @transform_0, window_bounds = array<i64: 4, 1, 8, 9, 4>}, {transform_indices = @transform_1, window_bounds = array<i64: 4, 1, 1, 9, 4>}, {transform_indices = @transform_2, window_bounds = array<i64: 128, 8>}, {transform_indices = @transform_3, window_bounds = array<i64: 1, 8>}, {transform_indices = @transform_4, window_bounds = array<i64: 1, 8, 8, 8>}]} {
    %c0 = arith.constant 0 : index
    %c0_0 = arith.constant 0 : index
    %c0_1 = arith.constant 0 : index
    %c0_2 = arith.constant 0 : index
    %c0_3 = arith.constant 0 : index
    %0 = vector.load %arg3[%c0, %c0_0, %c0_1, %c0_2, %c0_3] : memref<4x1x8x9x4xbf16, #tpu.memory_space<vmem>>, vector<4x1x8x9x4xbf16>
    %c0_4 = arith.constant 0 : index
    %c0_5 = arith.constant 0 : index
    %c0_6 = arith.constant 0 : index
    %c0_7 = arith.constant 0 : index
    %c0_8 = arith.constant 0 : index
    %1 = vector.load %arg4[%c0_4, %c0_5, %c0_6, %c0_7, %c0_8] : memref<4x1x1x9x4xbf16, #tpu.memory_space<vmem>>, vector<4x1x1x9x4xbf16>
    %2 = tpu.concatenate %0, %1 in 2 : vector<4x1x8x9x4xbf16>, vector<4x1x1x9x4xbf16> -> vector<4x1x9x9x4xbf16>
    %3 = vector.shape_cast %2 : vector<4x1x9x9x4xbf16> to vector<4x9x9x4xbf16>
    %4 = vector.extract_strided_slice %3 {offsets = [0, 0, 0, 0], sizes = [1, 8, 8, 4], strides = [1, 1, 1, 1]} : vector<4x9x9x4xbf16> to vector<1x8x8x4xbf16>
    %5 = vector.shape_cast %4 : vector<1x8x8x4xbf16> to vector<8x8x4xbf16>
    %6 = vector.shape_cast %5 : vector<8x8x4xbf16> to vector<64x4xbf16>
    %7 = vector.extract_strided_slice %3 {offsets = [1, 0, 0, 0], sizes = [1, 8, 8, 4], strides = [1, 1, 1, 1]} : vector<4x9x9x4xbf16> to vector<1x8x8x4xbf16>
    %8 = vector.shape_cast %7 : vector<1x8x8x4xbf16> to vector<8x8x4xbf16>
    %9 = vector.shape_cast %8 : vector<8x8x4xbf16> to vector<64x4xbf16>
    %10 = vector.extract_strided_slice %3 {offsets = [0, 0, 1, 0], sizes = [1, 8, 8, 4], strides = [1, 1, 1, 1]} : vector<4x9x9x4xbf16> to vector<1x8x8x4xbf16>
    %11 = vector.shape_cast %10 : vector<1x8x8x4xbf16> to vector<8x8x4xbf16>
    %12 = vector.shape_cast %11 : vector<8x8x4xbf16> to vector<64x4xbf16>
    %13 = vector.extract_strided_slice %3 {offsets = [2, 0, 0, 0], sizes = [1, 8, 8, 4], strides = [1, 1, 1, 1]} : vector<4x9x9x4xbf16> to vector<1x8x8x4xbf16>
    %14 = vector.shape_cast %13 : vector<1x8x8x4xbf16> to vector<8x8x4xbf16>
    %15 = vector.shape_cast %14 : vector<8x8x4xbf16> to vector<64x4xbf16>
    %16 = vector.extract_strided_slice %3 {offsets = [3, 0, 0, 0], sizes = [1, 8, 8, 4], strides = [1, 1, 1, 1]} : vector<4x9x9x4xbf16> to vector<1x8x8x4xbf16>
    %17 = vector.shape_cast %16 : vector<1x8x8x4xbf16> to vector<8x8x4xbf16>
    %18 = vector.shape_cast %17 : vector<8x8x4xbf16> to vector<64x4xbf16>
    %19 = vector.extract_strided_slice %3 {offsets = [2, 0, 1, 0], sizes = [1, 8, 8, 4], strides = [1, 1, 1, 1]} : vector<4x9x9x4xbf16> to vector<1x8x8x4xbf16>
    %20 = vector.shape_cast %19 : vector<1x8x8x4xbf16> to vector<8x8x4xbf16>
    %21 = vector.shape_cast %20 : vector<8x8x4xbf16> to vector<64x4xbf16>
    %22 = vector.extract_strided_slice %3 {offsets = [0, 1, 0, 0], sizes = [1, 8, 8, 4], strides = [1, 1, 1, 1]} : vector<4x9x9x4xbf16> to vector<1x8x8x4xbf16>
    %23 = vector.shape_cast %22 : vector<1x8x8x4xbf16> to vector<8x8x4xbf16>
    %24 = vector.shape_cast %23 : vector<8x8x4xbf16> to vector<64x4xbf16>
    %25 = vector.extract_strided_slice %3 {offsets = [1, 1, 0, 0], sizes = [1, 8, 8, 4], strides = [1, 1, 1, 1]} : vector<4x9x9x4xbf16> to vector<1x8x8x4xbf16>
    %26 = vector.shape_cast %25 : vector<1x8x8x4xbf16> to vector<8x8x4xbf16>
    %27 = vector.shape_cast %26 : vector<8x8x4xbf16> to vector<64x4xbf16>
    %28 = vector.extract_strided_slice %3 {offsets = [0, 1, 1, 0], sizes = [1, 8, 8, 4], strides = [1, 1, 1, 1]} : vector<4x9x9x4xbf16> to vector<1x8x8x4xbf16>
    %29 = vector.shape_cast %28 : vector<1x8x8x4xbf16> to vector<8x8x4xbf16>
    %30 = vector.shape_cast %29 : vector<8x8x4xbf16> to vector<64x4xbf16>
    %cst = arith.constant 0.000000e+00 : bf16
    %31 = vector.broadcast %cst : bf16 to vector<64x92xbf16>
    %32 = tpu.concatenate %6, %9, %12, %15, %18, %21, %24, %27, %30, %31 in 1 : vector<64x4xbf16>, vector<64x4xbf16>, vector<64x4xbf16>, vector<64x4xbf16>, vector<64x4xbf16>, vector<64x4xbf16>, vector<64x4xbf16>, vector<64x4xbf16>, vector<64x4xbf16>, vector<64x92xbf16> -> vector<64x128xbf16>
    %c0_9 = arith.constant 0 : index
    %c0_10 = arith.constant 0 : index
    %33 = vector.load %arg5[%c0_9, %c0_10] : memref<128x8xbf16, #tpu.memory_space<vmem>>, vector<128x8xbf16>
    %cst_11 = arith.constant dense<0.000000e+00> : vector<64x8xf32>
    %34 = tpu.matmul %32, %33, %cst_11 {dimension_numbers = #tpu.dot_dimension_numbers<[1], [0], [0], [1], [0, 0, 1, 1], [], []>} : vector<64x128xbf16>, vector<128x8xbf16>, vector<64x8xf32> -> vector<64x8xf32>
    %c0_12 = arith.constant 0 : index
    %c0_13 = arith.constant 0 : index
    %35 = vector.load %arg6[%c0_12, %c0_13] : memref<1x8xf32, #tpu.memory_space<vmem>>, vector<1x8xf32>
    %36 = vector.broadcast %35 : vector<1x8xf32> to vector<64x8xf32>
    %37 = arith.addf %34, %36 : vector<64x8xf32>
    %38 = vector.shape_cast %37 : vector<64x8xf32> to vector<1x8x8x8xf32>
    %c0_14 = arith.constant 0 : index
    %c0_15 = arith.constant 0 : index
    %c0_16 = arith.constant 0 : index
    %c0_17 = arith.constant 0 : index
    %39 = vector.load %arg7[%c0_14, %c0_15, %c0_16, %c0_17] : memref<1x8x8x8xf32, #tpu.memory_space<vmem>>, vector<1x8x8x8xf32>
    tpu.vector_store %arg7[%c0_14, %c0_15, %c0_16, %c0_17], %38 {strides = array<i32>} : memref<1x8x8x8xf32, #tpu.memory_space<vmem>>, vector<1x8x8x8xf32>,
    return
  }
  func.func @transform_0(%arg0: i32, %arg1: i32, %arg2: i32) -> (i32, i32, i32, i32, i32) {
    %c0_i32 = arith.constant 0 : i32
    %c0_i32_0 = arith.constant 0 : i32
    %c0_i32_1 = arith.constant 0 : i32
    %c0_i32_2 = arith.constant 0 : i32
    return %c0_i32, %arg0, %arg1, %c0_i32_0, %c0_i32_1 : i32, i32, i32, i32, i32
  }
  func.func @transform_1(%arg0: i32, %arg1: i32, %arg2: i32) -> (i32, i32, i32, i32, i32) {
    %c1_i32 = arith.constant 1 : i32
    %0 = arith.addi %arg1, %c1_i32 : i32
    %c8_i32 = arith.constant 8 : i32
    %1 = arith.muli %0, %c8_i32 : i32
    %c0_i32 = arith.constant 0 : i32
    %c0_i32_0 = arith.constant 0 : i32
    %c0_i32_1 = arith.constant 0 : i32
    %c0_i32_2 = arith.constant 0 : i32
    return %c0_i32, %arg0, %1, %c0_i32_0, %c0_i32_1 : i32, i32, i32, i32, i32
  }
  func.func @transform_2(%arg0: i32, %arg1: i32, %arg2: i32) -> (i32, i32) {
    %c0_i32 = arith.constant 0 : i32
    %c0_i32_0 = arith.constant 0 : i32
    return %c0_i32, %arg2 : i32, i32
  }
  func.func @transform_3(%arg0: i32, %arg1: i32, %arg2: i32) -> (i32, i32) {
    %c0_i32 = arith.constant 0 : i32
    %c0_i32_0 = arith.constant 0 : i32
    return %c0_i32, %arg2 : i32, i32
  }
  func.func @transform_4(%arg0: i32, %arg1: i32, %arg2: i32) -> (i32, i32, i32, i32) {
    %c0_i32 = arith.constant 0 : i32
    %c0_i32_0 = arith.constant 0 : i32
    return %arg0, %arg1, %c0_i32, %arg2 : i32, i32, i32, i32
  }
}

</mosaic_0001>

<bundles_post_ra>
// kernel: _lambda_.1
= control target key start
LH: loop header
LB: loop body
LE: loop exit
PB: predicated region body
PF: predicated region fallthrough
CT: control target
= control target key end

     0   :  { %s2053_s15 = smov 0   ;;  %s2055_s16 = smov 0   ;;  %s2573_s0 = inlined_call_operand.vmem [shape: bf16[4,2,9,9,4], index: 0, kind: input, shape index: {}, may-alias: {0,1}]   ;;  %s2574_s1 = inlined_call_operand.vmem [shape: bf16[4,2,9,9,4], index: 1, kind: input, shape index: {}, may-alias: {0,1}]   ;;  %s2575_s2 = inlined_call_operand.vmem [shape: bf16[128,8], index: 2, kind: input, shape index: {}]   ;;  %s2576_s3 = inlined_call_operand.vmem [shape: f32[1,8], index: 3, kind: input, shape index: {}]   ;;  %s2577_s4 = inlined_call_operand.vmem [shape: f32[2,8,8,8], index: 4, kind: output, shape index: {}]  }
   0x1   :  { %s2057_s17 = smov 0   ;;  %s2059_s18 = smov 0  }
   0x2   :  { %s2061_s19 = smov 0  }
   0x3 LB: > { %s33_s20 = sadd.s32 1, %s2010_s18  ;;  %p49_p1 = scmp.ne.s32.totalorder %s2002_s16, %s1998_s15  ;;  %s2014_s19 = sphi %s2061_s19, %s14_s19   ;;  %s2010_s18 = sphi %s2059_s18, %s2584_s18   ;;  %s2006_s17 = sphi %s2057_s17, %s2583_s17   ;;  %s2002_s16 = sphi %s2055_s16, %s2582_s16   ;;  %s1998_s15 = sphi %s2053_s15, %s2581_s15  }
   0x4   : > { %p35_p0 = scmp.ge.s32.totalorder %s33_s20, 2  ;;  %p50_p2 = scmp.eq.s32.totalorder %s2014_s19, 0 }
   0x5   : > { %s42_s23 = sadd.s32 1, %s2002_s16  ;;  %p1719_p5 = scmp.ge.s32.totalorder %s2014_s19, 2 }
   0x6   : > { %s2586_s20 = smov (%p35_p0, %s33_s20), 0  ;;  %p2084_p3 = por %p50_p2, %p49_p1 }
   0x7   : > { %s37_s22 = ssub.s32 %s2010_s18, %s2586_s20  ;;  %202 = sbr.rel (%p1719_p5) target bundleno = 79 (0x4f), region = 24 }
   0x8   : > { %p40_p4 = scmp.eq.s32.totalorder %s37_s22, 0 }
   0xa   : > { %s2092_s24 = scalar_select %p40_p4, %s2002_s16, %s42_s23  }
   0xe   : > { %205 = sbr.rel (!%p2084_p3) target bundleno = 72 (0x48), region = 28  ;;  %s207_s25 = sand.u32 (%p2084_p3), 1, %s2002_s16  }
   0xf   : > { %s1849_s26 = smul.u32 (%p2084_p3), 72, %s2010_s18  ;;  %s1720_s27 = sshll.u32 (%p2084_p3), %s207_s25, 8 }
  0x10   : > { %s2104_s5 = scalar_lea.vmem (%p2084_p3), [#allocation2], %s1720_s27   ;;  %s2106_s6 = smov (%p2084_p3), 0  }
  0x11   : > { %s2102_s30 = scalar_lea.vmem (%p2084_p3), %s2573_s0, %s1849_s26  }
  0x15 LB: >> { %v241_v0 = vld [vmem:[%s2102_s30] sm:$0xf]  ;;  %v243_v1 = vld [vmem:[%s2102_s30 + $0x4] sm:$0xf]  ;;  %v245_v2 = vld [vmem:[%s2102_s30 + $0x8] sm:$0xf]  ;;  %s2018_s6 = sphi %s2106_s6, %s235_s6  }
  0x16   : >> { %242 = vst [vmem:[%s2104_s5] sm:$0xf] %v241_v0  ;;  %244 = vst [vmem:[%s2104_s5 + $0x4] sm:$0xf] %v243_v1  ;;  %v247_v3 = vld [vmem:[%s2102_s30 + $0xc] sm:$0xf]  ;;  %s235_s6 = sadd.s32 1, %s2018_s6  }
  0x17   : >> { %246 = vst [vmem:[%s2104_s5 + $0x8] sm:$0xf] %v245_v2  ;;  %v249_v4 = vld [vmem:[%s2102_s30 + $0x10] sm:$0xf]  ;;  %v251_v5 = vld [vmem:[%s2102_s30 + $0x14] sm:$0xf] }
  0x18   : >> { %248 = vst [vmem:[%s2104_s5 + $0xc] sm:$0xf] %v247_v3  ;;  %250 = vst [vmem:[%s2104_s5 + $0x10] sm:$0xf] %v249_v4  ;;  %v253_v6 = vld [vmem:[%s2102_s30 + $0x18] sm:$0xf] }
  0x19   : >> { %252 = vst [vmem:[%s2104_s5 + $0x14] sm:$0xf] %v251_v5  ;;  %v255_v7 = vld [vmem:[%s2102_s30 + $0x1c] sm:$0xf]  ;;  %v257_v8 = vld [vmem:[%s2102_s30 + $0x20] sm:$0xf] }
  0x1a   : >> { %254 = vst [vmem:[%s2104_s5 + $0x18] sm:$0xf] %v253_v6  ;;  %256 = vst [vmem:[%s2104_s5 + $0x1c] sm:$0xf] %v255_v7  ;;  %v259_v9 = vld [vmem:[%s2102_s30 + $0x24] sm:$0xf] }
  0x1b   : >> { %258 = vst [vmem:[%s2104_s5 + $0x20] sm:$0xf] %v257_v8  ;;  %v261_v10 = vld [vmem:[%s2102_s30 + $0x28] sm:$0xf]  ;;  %v263_v11 = vld [vmem:[%s2102_s30 + $0x2c] sm:$0xf] }
  0x1c   : >> { %260 = vst [vmem:[%s2104_s5 + $0x24] sm:$0xf] %v259_v9  ;;  %262 = vst [vmem:[%s2104_s5 + $0x28] sm:$0xf] %v261_v10  ;;  %v265_v12 = vld [vmem:[%s2102_s30 + $0x30] sm:$0xf] }
  0x1d   : >> { %264 = vst [vmem:[%s2104_s5 + $0x2c] sm:$0xf] %v263_v11  ;;  %v267_v13 = vld [vmem:[%s2102_s30 + $0x34] sm:$0xf]  ;;  %v269_v14 = vld [vmem:[%s2102_s30 + $0x38] sm:$0xf] }
  0x1e   : >> { %266 = vst [vmem:[%s2104_s5 + $0x30] sm:$0xf] %v265_v12  ;;  %268 = vst [vmem:[%s2104_s5 + $0x34] sm:$0xf] %v267_v13  ;;  %v271_v15 = vld [vmem:[%s2102_s30 + $0x3c] sm:$0xf] }
  0x1f   : >> { %270 = vst [vmem:[%s2104_s5 + $0x38] sm:$0xf] %v269_v14  ;;  %v273_v16 = vld [vmem:[%s2102_s30 + $0x90] sm:$0xf]  ;;  %v275_v17 = vld [vmem:[%s2102_s30 + $0x94] sm:$0xf] }
  0x20   : >> { %272 = vst [vmem:[%s2104_s5 + $0x3c] sm:$0xf] %v271_v15  ;;  %274 = vst [vmem:[%s2104_s5 + $0x40] sm:$0xf] %v273_v16  ;;  %v277_v18 = vld [vmem:[%s2102_s30 + $0x98] sm:$0xf] }
  0x21   : >> { %276 = vst [vmem:[%s2104_s5 + $0x44] sm:$0xf] %v275_v17  ;;  %v279_v19 = vld [vmem:[%s2102_s30 + $0x9c] sm:$0xf]  ;;  %v281_v20 = vld [vmem:[%s2102_s30 + $0xa0] sm:$0xf] }
  0x22   : >> { %278 = vst [vmem:[%s2104_s5 + $0x48] sm:$0xf] %v277_v18  ;;  %280 = vst [vmem:[%s2104_s5 + $0x4c] sm:$0xf] %v279_v19  ;;  %v283_v21 = vld [vmem:[%s2102_s30 + $0xa4] sm:$0xf] }
  0x23   : >> { %282 = vst [vmem:[%s2104_s5 + $0x50] sm:$0xf] %v281_v20  ;;  %v285_v22 = vld [vmem:[%s2102_s30 + $0xa8] sm:$0xf]  ;;  %v287_v23 = vld [vmem:[%s2102_s30 + $0xac] sm:$0xf] }
  0x24   : >> { %284 = vst [vmem:[%s2104_s5 + $0x54] sm:$0xf] %v283_v21  ;;  %286 = vst [vmem:[%s2104_s5 + $0x58] sm:$0xf] %v285_v22  ;;  %v289_v24 = vld [vmem:[%s2102_s30 + $0xb0] sm:$0xf] }
  0x25   : >> { %288 = vst [vmem:[%s2104_s5 + $0x5c] sm:$0xf] %v287_v23  ;;  %v291_v25 = vld [vmem:[%s2102_s30 + $0xb4] sm:$0xf]  ;;  %v293_v26 = vld [vmem:[%s2102_s30 + $0xb8] sm:$0xf] }
  0x26   : >> { %290 = vst [vmem:[%s2104_s5 + $0x60] sm:$0xf] %v289_v24  ;;  %292 = vst [vmem:[%s2104_s5 + $0x64] sm:$0xf] %v291_v25  ;;  %v295_v27 = vld [vmem:[%s2102_s30 + $0xbc] sm:$0xf] }
  0x27   : >> { %294 = vst [vmem:[%s2104_s5 + $0x68] sm:$0xf] %v293_v26  ;;  %v297_v28 = vld [vmem:[%s2102_s30 + $0xc0] sm:$0xf]  ;;  %v299_v29 = vld [vmem:[%s2102_s30 + $0xc4] sm:$0xf] }
  0x28   : >> { %296 = vst [vmem:[%s2104_s5 + $0x6c] sm:$0xf] %v295_v27  ;;  %298 = vst [vmem:[%s2104_s5 + $0x70] sm:$0xf] %v297_v28  ;;  %v301_v30 = vld [vmem:[%s2102_s30 + $0xc8] sm:$0xf] }
  0x29   : >> { %300 = vst [vmem:[%s2104_s5 + $0x74] sm:$0xf] %v299_v29  ;;  %v303_v31 = vld [vmem:[%s2102_s30 + $0xcc] sm:$0xf]  ;;  %v305_v32 = vld [vmem:[%s2102_s30 + $0x120] sm:$0xf] }
  0x2a   : >> { %302 = vst [vmem:[%s2104_s5 + $0x78] sm:$0xf] %v301_v30  ;;  %304 = vst [vmem:[%s2104_s5 + $0x7c] sm:$0xf] %v303_v31  ;;  %v307_v33 = vld [vmem:[%s2102_s30 + $0x124] sm:$0xf] }
  0x2b   : >> { %306 = vst [vmem:[%s2104_s5 + $0x80] sm:$0xf] %v305_v32  ;;  %v309_v34 = vld [vmem:[%s2102_s30 + $0x128] sm:$0xf]  ;;  %v311_v35 = vld [vmem:[%s2102_s30 + $0x12c] sm:$0xf] }
  0x2c   : >> { %308 = vst [vmem:[%s2104_s5 + $0x84] sm:$0xf] %v307_v33  ;;  %310 = vst [vmem:[%s2104_s5 + $0x88] sm:$0xf] %v309_v34  ;;  %v313_v36 = vld [vmem:[%s2102_s30 + $0x130] sm:$0xf] }
  0x2d   : >> { %312 = vst [vmem:[%s2104_s5 + $0x8c] sm:$0xf] %v311_v35  ;;  %v315_v37 = vld [vmem:[%s2102_s30 + $0x134] sm:$0xf]  ;;  %v317_v38 = vld [vmem:[%s2102_s30 + $0x138] sm:$0xf] }
  0x2e   : >> { %314 = vst [vmem:[%s2104_s5 + $0x90] sm:$0xf] %v313_v36  ;;  %316 = vst [vmem:[%s2104_s5 + $0x94] sm:$0xf] %v315_v37  ;;  %v319_v39 = vld [vmem:[%s2102_s30 + $0x13c] sm:$0xf] }
  0x2f   : >> { %318 = vst [vmem:[%s2104_s5 + $0x98] sm:$0xf] %v317_v38  ;;  %v321_v40 = vld [vmem:[%s2102_s30 + $0x140] sm:$0xf]  ;;  %v323_v41 = vld [vmem:[%s2102_s30 + $0x144] sm:$0xf] }
  0x30   : >> { %320 = vst [vmem:[%s2104_s5 + $0x9c] sm:$0xf] %v319_v39  ;;  %322 = vst [vmem:[%s2104_s5 + $0xa0] sm:$0xf] %v321_v40  ;;  %v325_v42 = vld [vmem:[%s2102_s30 + $0x148] sm:$0xf] }
  0x31   : >> { %324 = vst [vmem:[%s2104_s5 + $0xa4] sm:$0xf] %v323_v41  ;;  %v327_v43 = vld [vmem:[%s2102_s30 + $0x14c] sm:$0xf]  ;;  %v329_v44 = vld [vmem:[%s2102_s30 + $0x150] sm:$0xf] }
  0x32   : >> { %326 = vst [vmem:[%s2104_s5 + $0xa8] sm:$0xf] %v325_v42  ;;  %328 = vst [vmem:[%s2104_s5 + $0xac] sm:$0xf] %v327_v43  ;;  %v331_v45 = vld [vmem:[%s2102_s30 + $0x154] sm:$0xf] }
  0x33   : >> { %330 = vst [vmem:[%s2104_s5 + $0xb0] sm:$0xf] %v329_v44  ;;  %v333_v46 = vld [vmem:[%s2102_s30 + $0x158] sm:$0xf]  ;;  %v335_v47 = vld [vmem:[%s2102_s30 + $0x15c] sm:$0xf] }
  0x34   : >> { %332 = vst [vmem:[%s2104_s5 + $0xb4] sm:$0xf] %v331_v45  ;;  %334 = vst [vmem:[%s2104_s5 + $0xb8] sm:$0xf] %v333_v46  ;;  %v337_v48 = vld [vmem:[%s2102_s30 + $0x1b0] sm:$0xf] }
  0x35   : >> { %336 = vst [vmem:[%s2104_s5 + $0xbc] sm:$0xf] %v335_v47  ;;  %v339_v49 = vld [vmem:[%s2102_s30 + $0x1b4] sm:$0xf]  ;;  %v341_v50 = vld [vmem:[%s2102_s30 + $0x1b8] sm:$0xf] }
  0x36   : >> { %338 = vst [vmem:[%s2104_s5 + $0xc0] sm:$0xf] %v337_v48  ;;  %340 = vst [vmem:[%s2104_s5 + $0xc4] sm:$0xf] %v339_v49  ;;  %v343_v51 = vld [vmem:[%s2102_s30 + $0x1bc] sm:$0xf] }
  0x37   : >> { %342 = vst [vmem:[%s2104_s5 + $0xc8] sm:$0xf] %v341_v50  ;;  %v345_v52 = vld [vmem:[%s2102_s30 + $0x1c0] sm:$0xf]  ;;  %v347_v53 = vld [vmem:[%s2102_s30 + $0x1c4] sm:$0xf] }
  0x38   : >> { %344 = vst [vmem:[%s2104_s5 + $0xcc] sm:$0xf] %v343_v51  ;;  %346 = vst [vmem:[%s2104_s5 + $0xd0] sm:$0xf] %v345_v52  ;;  %v349_v54 = vld [vmem:[%s2102_s30 + $0x1c8] sm:$0xf] }
  0x39   : >> { %348 = vst [vmem:[%s2104_s5 + $0xd4] sm:$0xf] %v347_v53  ;;  %v351_v55 = vld [vmem:[%s2102_s30 + $0x1cc] sm:$0xf]  ;;  %v353_v56 = vld [vmem:[%s2102_s30 + $0x1d0] sm:$0xf] }
  0x3a   : >> { %350 = vst [vmem:[%s2104_s5 + $0xd8] sm:$0xf] %v349_v54  ;;  %352 = vst [vmem:[%s2104_s5 + $0xdc] sm:$0xf] %v351_v55  ;;  %v355_v57 = vld [vmem:[%s2102_s30 + $0x1d4] sm:$0xf] }
  0x3b   : >> { %354 = vst [vmem:[%s2104_s5 + $0xe0] sm:$0xf] %v353_v56  ;;  %v357_v58 = vld [vmem:[%s2102_s30 + $0x1d8] sm:$0xf]  ;;  %v359_v59 = vld [vmem:[%s2102_s30 + $0x1dc] sm:$0xf] }
  0x3c   : >> { %356 = vst [vmem:[%s2104_s5 + $0xe4] sm:$0xf] %v355_v57  ;;  %358 = vst [vmem:[%s2104_s5 + $0xe8] sm:$0xf] %v357_v58  ;;  %v361_v60 = vld [vmem:[%s2102_s30 + $0x1e0] sm:$0xf] }
  0x3d   : >> { %360 = vst [vmem:[%s2104_s5 + $0xec] sm:$0xf] %v359_v59  ;;  %v363_v61 = vld [vmem:[%s2102_s30 + $0x1e4] sm:$0xf]  ;;  %v365_v62 = vld [vmem:[%s2102_s30 + $0x1e8] sm:$0xf] }
  0x3e   : >> { %362 = vst [vmem:[%s2104_s5 + $0xf0] sm:$0xf] %v361_v60  ;;  %364 = vst [vmem:[%s2104_s5 + $0xf4] sm:$0xf] %v363_v61  ;;  %v367_v63 = vld [vmem:[%s2102_s30 + $0x1ec] sm:$0xf] }
  0x3f   : >> { %366 = vst [vmem:[%s2104_s5 + $0xf8] sm:$0xf] %v365_v62  ;;  %368 = vst [vmem:[%s2104_s5 + $0xfc] sm:$0xf] %v367_v63  ;;  %p234_p6 = scmp.ge.s32.totalorder %s235_s6, 1 }
  0x41   : > { %237 = sbr.rel (!%p234_p6) target bundleno = 21 (0x15), region = 202 }
  0x48 PF: > { %629 = sbr.rel (!%p2084_p3) target bundleno = 79 (0x4f), region = 90  ;;  %s631_s7 = sand.u32 (%p2084_p3), 1, %s2002_s16  }
  0x49   : > { %s1731_s8 = smul.u32 (%p2084_p3), 72, %s2010_s18  ;;  %s1730_s9 = sshll.u32 (%p2084_p3), %s631_s7, 5 }
  0x4a   : > { %s633_s13 = scalar_lea.vmem (%p2084_p3), [#allocation3], %s1730_s9 }
  0x4b   : > { %s1590_s12 = scalar_lea.vmem (%p2084_p3), %s2574_s1, %s1731_s8 }
  0x4c   : > { %v1732_v0 = vld [vmem:[%s1590_s12 + $0x40] sm:$0xff] (%p2084_p3)   ;;  %v1734_v1 = vld [vmem:[%s1590_s12 + $0xd0] sm:$0xff] (%p2084_p3)  }
  0x4d   : > { %v1736_v2 = vld [vmem:[%s1590_s12 + $0x160] sm:$0xff] (%p2084_p3)   ;;  %657 = vst [vmem:[%s633_s13] sm:$0xff] (%p2084_p3), %v1732_v0   ;;  %661 = vst [vmem:[%s633_s13 + $0x8] sm:$0xff] (%p2084_p3), %v1734_v1   ;;  %v1738_v3 = vld [vmem:[%s1590_s12 + $0x1f0] sm:$0xff] (%p2084_p3)  }
  0x4e   : > { %665 = vst [vmem:[%s633_s13 + $0x10] sm:$0xff] (%p2084_p3), %v1736_v2   ;;  %669 = vst [vmem:[%s633_s13 + $0x18] sm:$0xff] (%p2084_p3), %v1738_v3  }
  0x4f PF: > { %p1740_p7 = scmp.ge.s32.totalorder %s2014_s19, 1  ;;  %p709_p8 = scmp.lt.s32.totalorder %s2014_s19, 3 }
  0x51   : > { %p710_p9 = pnand %p1740_p7, %p709_p8 }
  0x52   : > { %s716_s14 = sand.u32 (!%p710_p9), 1, %s1998_s15   ;;  %vm846_vm0 = vsmask.f32 (!%p710_p9), 3328  ;;  %vm847_vm1 = vsmask.f32 (!%p710_p9), 7440  ;;  %s2020_s23 = smov (!%p710_p9), 4  }
  0x53   : > { %713 = sbr.rel (%p710_p9) target bundleno = 497 (0x1f1), region = 131  ;;  %s1741_s21 = sshll.u32 (!%p710_p9), %s716_s14, 8  ;;  %vm2316_vm2 = vmor (!%p710_p9), %vm846_vm0, %vm847_vm1  ;;  %vm1285_vm3 = vcmask (!%p710_p9), 64512   ;;  %vm1272_vm4 = vcmask (!%p710_p9), 31744   ;;  %vm1294_vm5 = vcmask (!%p710_p9), 97280   ;;  %vm1303_vm6 = vcmask (!%p710_p9), 130048  }
  0x54   : > { %s2254_s22 = scalar_lea.vmem (!%p710_p9), [#allocation2], %s1741_s21  ;;  %s2021_s25 = smov (!%p710_p9), 8   ;;  %vm1312_vm7 = vcmask (!%p710_p9), 162816   ;;  %vm1321_vm8 = vcmask (!%p710_p9), 195584   ;;  %vm1330_vm9 = vcmask (!%p710_p9), 228352   ;;  %vm1339_vm10 = vcmask (!%p710_p9), 261120  }
  0x55   : > { %v2257_v4 = vld [vmem:[%s2254_s22 + $0x50] sm:$0xf] (!%p710_p9)  ;;  %v2260_v5 = vld [vmem:[%s2254_s22 + $0x58] sm:$0xf] (!%p710_p9)  ;;  %v2263_v6 = vld [vmem:[%s2254_s22 + $0x60] sm:$0xf] (!%p710_p9) }
  0x56   : > { %v1750_v7 = vcombine.low (!%p710_p9), %v2257_v4, %v2260_v5  ;;  %v811_v8 = vld [vmem:[%s2254_s22 + $0x40] sm:$0xf] (!%p710_p9)  ;;  %v2269_v9 = vld [vmem:[%s2254_s22 + $0x48] sm:$0xf] (!%p710_p9)  ;;  %v2272_v10 = vld [vmem:[%s2254_s22 + $0x70] sm:$0xf] (!%p710_p9) }
  0x57   : > { %v1749_v11 = vcombine.low (!%p710_p9), %v811_v8, %v2269_v9  ;;  %v2276_v12 = vld [vmem:[%s2254_s22 + $0x78] sm:$0xf] (!%p710_p9)  ;;  %v2279_v13 = vld [vmem:[%s2254_s22 + $0x68] sm:$0xf] (!%p710_p9)  ;;  %v2282_v14 = vld [vmem:[%s2254_s22 + $0x20] sm:$0xf] (!%p710_p9) }
  0x58   : > { %1129 = vrot.lane.b32.xlu1 (!%p710_p9), %v1750_v7, %s2020_s23  ;;  %v1752_v15 = vcombine.low (!%p710_p9), %v2272_v10, %v2276_v12  ;;  %v1751_v16 = vcombine.low (!%p710_p9), %v2263_v6, %v2279_v13  ;;  %v804_v17 = vld [vmem:[%s2254_s22 + $0x24] sm:$0x1] (!%p710_p9)  ;;  %v2290_v18 = vld [vmem:[%s2254_s22 + $0x28] sm:$0xf] (!%p710_p9)  ;;  %v806_v19 = vld [vmem:[%s2254_s22 + $0x2c] sm:$0x1] (!%p710_p9) }
  0x59   : > { %1127 = vrot.lane.b32.xlu0 (!%p710_p9), %v1749_v11, %s2020_s23  ;;  %v906_v20 = vshrl.u32 (!%p710_p9), %v2282_v14, 16  ;;  %v909_v21 = vshll.u32 (!%p710_p9), %v2282_v14, 16  ;;  %v915_v22 = vshll.u32 (!%p710_p9), %v804_v17, 16  ;;  %v920_v23 = vshrl.u32 (!%p710_p9), %v2290_v18, 16  ;;  %v2297_v24 = vld [vmem:[%s2254_s22] sm:$0xf] (!%p710_p9) }
  0x5a   : > { %v923_v25 = vshll.u32 %v2290_v18, 16  ;;  %v929_v26 = vshll.u32 %v806_v19, 16  ;;  %v796_v27 = vld [vmem:[%s2254_s22 + $0x4] sm:$0x1]  ;;  %v2302_v28 = vld [vmem:[%s2254_s22 + $0x8] sm:$0xf]  ;;  %v1747_v29 = vcombine.low %v2282_v14, %v2290_v18 }
  0x5b   : > { %v908_v30 = vrot.slane %v906_v20, 4  ;;  %v911_v31 = vrot.slane %v909_v21, 5  ;;  %v917_v32 = vrot.slane %v915_v22, 5  ;;  %v922_v33 = vrot.slane %v920_v23, 4  ;;  %v798_v34 = vld [vmem:[%s2254_s22 + $0xc] sm:$0x1] }
  0x5c   : > { %1133 = vrot.lane.b32.xlu1 %v1752_v15, %s2020_s23  ;;  %v925_v35 = vrot.slane %v923_v25, 5  ;;  %v931_v36 = vrot.slane %v929_v26, 5  ;;  %v850_v37 = vshrl.u32 %v2297_v24, 16  ;;  %v853_v38 = vshll.u32 %v2297_v24, 16  ;;  %v2312_v43 = vld [vmem:[%s2254_s22 + $0x30] sm:$0xf] }
  0x5d   : > { %1131 = vrot.lane.b32.xlu0 %v1751_v16, %s2020_s23  ;;  %v912_v39 = vor.u32 %v911_v31, %v908_v30  ;;  %v859_v40 = vshll.u32 %v796_v27, 16  ;;  %v864_v41 = vshrl.u32 %v2302_v28, 16  ;;  %v867_v42 = vshll.u32 %v2302_v28, 16  ;;  %v808_v49 = vld [vmem:[%s2254_s22 + $0x34] sm:$0x1]  ;;  %s2022_s26 = smov 12  }
  0x5e   : > { %v926_v45 = vor.u32 %v925_v35, %v922_v33  ;;  %v852_v46 = vrot.slane %v850_v37, 4  ;;  %v855_v47 = vrot.slane %v853_v38, 5  ;;  %v873_v48 = vshll.u32 %v798_v34, 16  ;;  %v2322_v54 = vld [vmem:[%s2254_s22 + $0x38] sm:$0xf]  ;;  %s2023_s5 = smov 16  }
  0x5f   : > { %v913_v50 = vrot.slane %v912_v39, 4  ;;  %v861_v51 = vrot.slane %v859_v40, 5  ;;  %v866_v52 = vrot.slane %v864_v41, 4  ;;  %v869_v53 = vrot.slane %v867_v42, 5  ;;  %v810_v61 = vld [vmem:[%s2254_s22 + $0x3c] sm:$0x1] }
  0x60   : > { %v927_v55 = vrot.slane %v926_v45, 4  ;;  %v856_v56 = vor.u32 %v855_v47, %v852_v46  ;;  %v875_v57 = vrot.slane %v873_v48, 5  ;;  %v934_v58 = vshrl.u32 %v2312_v43, 16  ;;  %v2337_v7 = vld [vmem:[%s2254_s22 + $0x10] sm:$0xf]  ;;  %s1742_s8 = sshll.u32 %s716_s14, 5 }
  0x61   : > { %v2327_v59 = vsel %vm2316_vm2, %v913_v50, %v917_v32  ;;  %v870_v60 = vor.u32 %v869_v53, %v866_v52  ;;  %v937_v62 = vshll.u32 %v2312_v43, 16  ;;  %v943_v63 = vshll.u32 %v808_v49, 16  ;;  %v800_v16 = vld [vmem:[%s2254_s22 + $0x14] sm:$0x1]  ;;  %v2346_v22 = vld [vmem:[%s2254_s22 + $0x18] sm:$0xf] }
  0x62   : > { %v2333_v0 = vsel %vm2316_vm2, %v927_v55, %v931_v36  ;;  %v857_v1 = vrot.slane %v856_v56, 4  ;;  %v936_v2 = vrot.slane %v934_v58, 4  ;;  %v948_v3 = vshrl.u32 %v2322_v54, 16  ;;  %v802_v26 = vld [vmem:[%s2254_s22 + $0x1c] sm:$0x1]  ;;  %s2024_s11 = smov 20  }
  0x63   : > { %v1755_v8 = vcombine.low %v2327_v59, %v2333_v0  ;;  %v871_v11 = vrot.slane %v870_v60, 4  ;;  %v939_v15 = vrot.slane %v937_v62, 5  ;;  %v951_v20 = vshll.u32 %v2322_v54, 16  ;;  %v827_v45 = vld [vmem:[%s2254_s22 + $0xa0] sm:$0xf]  ;;  %s725_s13 = scalar_lea.vmem [#allocation3], %s1742_s8 }
  0x64   : > { %v862_v17 = vsel %vm2316_vm2, %v857_v1, %v861_v51  ;;  %v950_v19 = vrot.slane %v948_v3, 4  ;;  %v957_v21 = vshll.u32 %v810_v61, 16  ;;  %v878_v27 = vshrl.u32 %v2337_v7, 16  ;;  %v829_v49 = vld [vmem:[%s2254_s22 + $0xa8] sm:$0xf]  ;;  %s2026_s28 = smov 28  }
  0x65   : > { %1151 = vrot.lane.b32.xlu1 %v1755_v8, %s2021_s25  ;;  %v2351_v23 = vsel %vm2316_vm2, %v871_v11, %v875_v57  ;;  %v940_v25 = vor.u32 %v939_v15, %v936_v2  ;;  %v881_v30 = vshll.u32 %v2337_v7, 16  ;;  %v945_v32 = vrot.slane %v943_v63, 5  ;;  %v819_v58 = vld [vmem:[%s2254_s22 + $0x80] sm:$0xf]  ;;  %v821_v60 = vld [vmem:[%s2254_s22 + $0x88] sm:$0xf] }
  0x66   : > { %v1753_v31 = vcombine.low %v862_v17, %v2351_v23  ;;  %v953_v33 = vrot.slane %v951_v20, 5  ;;  %v887_v34 = vshll.u32 %v800_v16, 16  ;;  %v880_v36 = vrot.slane %v878_v27, 4  ;;  %v831_v15 = vld [vmem:[%s2254_s22 + $0xb0] sm:$0xf]  ;;  %s2027_s29 = smov 32  }
  0x67   : > { %v941_v35 = vrot.slane %v940_v25, 4  ;;  %v883_v37 = vrot.slane %v881_v30, 5  ;;  %v892_v38 = vshrl.u32 %v2346_v22, 16  ;;  %v959_v40 = vrot.slane %v957_v21, 5  ;;  %v833_v21 = vld [vmem:[%s2254_s22 + $0xb8] sm:$0xf] }
  0x68   : > { %1147 = vrot.lane.b32.xlu0 %v1753_v31, %s2021_s25  ;;  %v954_v39 = vor.u32 %v953_v33, %v950_v19  ;;  %v895_v41 = vshll.u32 %v2346_v22, 16  ;;  %v901_v42 = vshll.u32 %v802_v26, 16  ;;  %v889_v47 = vrot.slane %v887_v34, 5  ;;  %v2382_v31 = vld [vmem:[%s2254_s22 + $0x90] sm:$0xf]  ;;  %p782_p10 = scmp.lt.s32.totalorder %s2006_s17, 1 }
  0x69   : > { %v884_v46 = vor.u32 %v883_v37, %v880_v36  ;;  %v894_v48 = vrot.slane %v892_v38, 4  ;;  %v1018_v50 = vshrl.u32 %v827_v45, 16  ;;  %v2364_v51 = vsel %vm2316_vm2, %v941_v35, %v945_v32  ;;  %v2389_v36 = vld [vmem:[%s2254_s22 + $0x98] sm:$0xf] }
  0x6a   : > { %v955_v52 = vrot.slane %v954_v39, 4  ;;  %v897_v53 = vrot.slane %v895_v41, 5  ;;  %v1021_v55 = vshll.u32 %v827_v45, 16  ;;  %v903_v57 = vrot.slane %v901_v42, 5  ;;  %s2588_s17 = smov (!%p782_p10, %s2006_s17), 1 }
  0x6b   : > { %v885_v56 = vrot.slane %v884_v46, 4  ;;  %v1032_v63 = vshrl.u32 %v829_v49, 16  ;;  %v1035_v1 = vshll.u32 %v829_v49, 16  ;;  %v1020_v8 = vrot.slane %v1018_v50, 4  ;;  %s1796_s30 = sshll.u32 %s2588_s17, 6 }
  0x6c   : > { %v2370_v61 = vsel %vm2316_vm2, %v955_v52, %v959_v40  ;;  %v898_v62 = vor.u32 %v897_v53, %v894_v48  ;;  %v1023_v11 = vrot.slane %v1021_v55, 5  ;;  %v962_v17 = vshrl.u32 %v819_v58, 16  ;;  %v828_v52 = vld [vmem:[%s2254_s22 + $0xa4] sm:$0x1]  ;;  %s792_s9 = scalar_lea.vmem %s2577_s4, %s1796_s30 }
  0x6d   : > { %v1756_v2 = vcombine.low %v2364_v51, %v2370_v61  ;;  %v2376_v3 = vsel %vm2316_vm2, %v885_v56, %v889_v47  ;;  %v965_v19 = vshll.u32 %v819_v58, 16  ;;  %v976_v20 = vshrl.u32 %v821_v60, 16 }
  0x6e   : > { %v899_v16 = vrot.slane %v898_v62, 4  ;;  %v1759_v25 = vcombine.low %v827_v45, %v829_v49  ;;  %v979_v26 = vshll.u32 %v821_v60, 16  ;;  %v1046_v27 = vshrl.u32 %v831_v15, 16 }
  0x6f   : > { %1153 = vrot.lane.b32.xlu1 %v1756_v2, %s2021_s25  ;;  %v1049_v30 = vshll.u32 %v831_v15, 16  ;;  %v1034_v33 = vrot.slane %v1032_v63, 4  ;;  %v1037_v34 = vrot.slane %v1035_v1, 5  ;;  %v1757_v35 = vcombine.low %v819_v58, %v821_v60  ;;  %v820_v2 = vld [vmem:[%s2254_s22 + $0x84] sm:$0x1] }
  0x70   : > { %v2386_v32 = vsel %vm2316_vm2, %v899_v16, %v903_v57  ;;  %v964_v38 = vrot.slane %v962_v17, 4  ;;  %v967_v39 = vrot.slane %v965_v19, 5  ;;  %v978_v40 = vrot.slane %v976_v20, 4  ;;  %v830_v57 = vld [vmem:[%s2254_s22 + $0xac] sm:$0x1] }
  0x71   : > { %v1754_v37 = vcombine.low %v2376_v3, %v2386_v32  ;;  %v981_v41 = vrot.slane %v979_v26, 5  ;;  %v1060_v42 = vshrl.u32 %v833_v21, 16  ;;  %v1063_v45 = vshll.u32 %v833_v21, 16  ;;  %v822_v20 = vld [vmem:[%s2254_s22 + $0x8c] sm:$0x1] }
  0x72   : > { %v990_v46 = vshrl.u32 %v2382_v31, 16  ;;  %v1048_v47 = vrot.slane %v1046_v27, 4  ;;  %v1051_v48 = vrot.slane %v1049_v30, 5  ;;  %v1760_v49 = vcombine.low %v831_v15, %v833_v21  ;;  %v1940_v15 = vld [vmem:[%s2254_s22 + $0xe0] ss:$8 sps:$4 sm:$0xff]  }
  0x73   : > { %1149 = vrot.lane.b32.xlu0 %v1754_v37, %s2021_s25  ;;  %1179 = vrot.lane.b32.xlu1 %v1759_v25, %s2022_s26  ;;  %v993_v50 = vshll.u32 %v2382_v31, 16  ;;  %v1004_v53 = vshrl.u32 %v2389_v36, 16  ;;  %v1007_v55 = vshll.u32 %v2389_v36, 16  ;;  %v1758_v56 = vcombine.low %v2382_v31, %v2389_v36  ;;  %v832_v27 = vld [vmem:[%s2254_s22 + $0xb4] sm:$0x1]  ;;  %v1952_v30 = vld [vmem:[%s2575_s2] sm:$0xff]  }
  0x74   : > { %v1024_v58 = vor.u32 %v1023_v11, %v1020_v8  ;;  %v1062_v60 = vrot.slane %v1060_v42, 4  ;;  %v1065_v62 = vrot.slane %v1063_v45, 5  ;;  %v2403_v63 = vrot.slane %v990_v46, 4  ;;  %v834_v36 = vld [vmem:[%s2254_s22 + $0xbc] sm:$0x1]  ;;  %1809 = vmatprep.subr.bf16.mxu0 %v1952_v30  ;;  %1833 = vmatprep.subr.bf16.mxu1 %v1952_v30  ;;  %v1953_v46 = vld [vmem:[%s2575_s2 + $0x8] sm:$0xff]  }
  0x75   : > { %v1027_v1 = vshll.u32 %v828_v52, 16  ;;  %v1038_v17 = vor.u32 %v1037_v34, %v1034_v33  ;;  %v1041_v19 = vshll.u32 %v830_v57, 16  ;;  %v968_v21 = vor.u32 %v967_v39, %v964_v38  ;;  %v1941_v39 = vld [vmem:[%s2254_s22 + $0xc0] ss:$8 sps:$4 sm:$0xff]   ;;  %v1942_v42 = vld [vmem:[%s2254_s22 + $0xf0] ss:$8 sps:$4 sm:$0xff]   ;;  %1810 = vmatpush3.bf16.msra.mxu0 %v1952_v30  ;;  %1841 = vmatpush3.bf16.msra.mxu1 %v1952_v30 }
  0x76   : > { %v1025_v16 = vrot.slane %v1024_v58, 4  ;;  %v971_v11 = vshll.u32 %v820_v2, 16  ;;  %v982_v25 = vor.u32 %v981_v41, %v978_v40  ;;  %v985_v26 = vshll.u32 %v822_v20, 16  ;;  %v824_v41 = vld [vmem:[%s2254_s22 + $0x94] sm:$0x1]  ;;  %1811 = vmatprep.subr.bf16.mxu0 %v1953_v46  ;;  %1834 = vmatprep.subr.bf16.mxu1 %v1953_v46 }
  0x77   : > { %1175 = vrot.lane.b32.xlu0 %v1757_v35, %s2022_s26  ;;  %1181 = vrot.lane.b32.xlu1 %v1760_v49, %s2022_s26  ;;  %v1029_v8 = vrot.slane %v1027_v1, 5  ;;  %v995_v31 = vrot.slane %v993_v50, 5  ;;  %v1039_v33 = vrot.slane %v1038_v17, 4  ;;  %v1043_v34 = vrot.slane %v1041_v19, 5  ;;  %v1943_v20 = vld [vmem:[%s2254_s22 + $0xd0] ss:$8 sps:$4 sm:$0xff]  }
  0x78   : > { %v1052_v37 = vor.u32 %v1051_v48, %v1048_v47  ;;  %v1006_v35 = vrot.slane %v1004_v53, 4  ;;  %v1009_v38 = vrot.slane %v1007_v55, 5  ;;  %v969_v40 = vrot.slane %v968_v21, 4  ;;  %v826_v47 = vld [vmem:[%s2254_s22 + $0x9c] sm:$0x1]  ;;  %s2025_s22 = smov 24  }
  0x79   : > { %v1030_v45 = vsel %vm2316_vm2, %v1025_v16, %v1029_v8  ;;  %v973_v49 = vrot.slane %v971_v11, 5  ;;  %v983_v50 = vrot.slane %v982_v25, 4  ;;  %v1055_v52 = vshll.u32 %v832_v27, 16  ;;  %1812 = vmatpush3.bf16.msra.mxu0 %v1953_v46  ;;  %1842 = vmatpush3.bf16.msra.mxu1 %v1953_v46 }
  0x7a   : > { %v1066_v57 = vor.u32 %v1065_v62, %v1062_v60  ;;  %v1044_v48 = vsel %vm2316_vm2, %v1039_v33, %v1043_v34  ;;  %v987_v53 = vrot.slane %v985_v26, 5  ;;  %v1053_v55 = vrot.slane %v1052_v37, 4 }
  0x7b   : > { %1177 = vrot.lane.b32.xlu0 %v1758_v56, %s2022_s26  ;;  %1207 = vrot.lane.b32.xlu1 %v1940_v15, %s2023_s5  ;;  %v1069_v58 = vshll.u32 %v834_v36, 16  ;;  %v1057_v1 = vrot.slane %v1055_v52, 5  ;;  %v996_v16 = vor.u32 %v995_v31, %v2403_v63  ;;  %v999_v62 = vshll.u32 %v824_v41, 16  ;;  %v1954_v15 = vld [vmem:[%s2575_s2 + $0x10] sm:$0xff]   ;;  %v1955_v31 = vld [vmem:[%s2575_s2 + $0x18] sm:$0xff]  }
  0x7c   : > { %v1067_v2 = vrot.slane %v1066_v57, 4  ;;  %v1010_v17 = vor.u32 %v1009_v38, %v1006_v35  ;;  %v1013_v56 = vshll.u32 %v826_v47, 16  ;;  %v1767_v19 = vcombine.low %v1030_v45, %v1044_v48  ;;  %1813 = vmatprep.subr.bf16.mxu0 %v1954_v15  ;;  %1835 = vmatprep.subr.bf16.mxu1 %v1954_v15  ;;  %v843_v41 = vld [vmem:[%s725_s13] sm:$0xf] }
  0x7d   : > { %v1071_v60 = vrot.slane %v1069_v58, 5  ;;  %v974_v63 = vsel %vm2316_vm2, %v969_v40, %v973_v49  ;;  %v988_v21 = vsel %vm2316_vm2, %v983_v50, %v987_v53  ;;  %v997_v8 = vrot.slane %v996_v16, 4  ;;  %1814 = vmatpush3.bf16.msra.mxu0 %v1954_v15  ;;  %1843 = vmatpush3.bf16.msra.mxu1 %v1954_v15  ;;  %v1957_v50 = vld [vmem:[%s2575_s2 + $0x28] sm:$0xff]   ;;  %v844_v53 = vld [vmem:[%s725_s13 + $0x4] sm:$0x1] }
  0x7e   : > { %v1001_v11 = vrot.slane %v999_v62, 5  ;;  %v1058_v25 = vsel %vm2316_vm2, %v1053_v55, %v1057_v1  ;;  %v1011_v27 = vrot.slane %v1010_v17, 4  ;;  %v1015_v30 = vrot.slane %v1013_v56, 5  ;;  %1815 = vmatprep.subr.bf16.mxu0 %v1955_v31  ;;  %1836 = vmatprep.subr.bf16.mxu1 %v1955_v31  ;;  %v1958_v55 = vld [vmem:[%s2575_s2 + $0x30] sm:$0xff]   ;;  %v1959_v62 = vld [vmem:[%s2575_s2 + $0x38] sm:$0xff]  }
  0x7f   : > { %1203 = vrot.lane.b32.xlu0 %v1941_v39, %s2023_s5  ;;  %1209 = vrot.lane.b32.xlu1 %v1942_v42, %s2023_s5  ;;  %v1072_v26 = vsel %vm2316_vm2, %v1067_v2, %v1071_v60  ;;  %v1765_v33 = vcombine.low %v974_v63, %v988_v21  ;;  %v1746_v37 = vcombine.low %v2337_v7, %v2346_v22  ;;  %v1956_v42 = vld [vmem:[%s2575_s2 + $0x20] sm:$0xff]   ;;  %v1074_v46 = vshrl.u32 %v843_v41, 16  ;;  %v845_v2 = vld [vmem:[%s725_s13 + $0x8] sm:$0xf] }
  0x80   : > { %v1768_v34 = vcombine.low %v1058_v25, %v1072_v26  ;;  %v1002_v36 = vsel %vm2316_vm2, %v997_v8, %v1001_v11  ;;  %v1016_v35 = vsel %vm2316_vm2, %v1011_v27, %v1015_v30  ;;  %v1745_v38 = vcombine.low %v2297_v24, %v2302_v28 }
  0x81   : > { %v1748_v39 = vcombine.low %v2312_v43, %v2322_v54  ;;  %1816 = vmatpush3.bf16.msra.mxu0 %v1955_v31  ;;  %1844 = vmatpush3.bf16.msra.mxu1 %v1955_v31  ;;  %v1766_v45 = vcombine.low %v1002_v36, %v1016_v35  ;;  %v1771_v40 = vcombine.low %v2290_v18, %v2312_v43  ;;  %v1077_v49 = vshll.u32 %v843_v41, 16 }
  0x82   : > { %1817 = vmatprep.subr.bf16.mxu0 %v1956_v42  ;;  %1837 = vmatprep.subr.bf16.mxu1 %v1956_v42  ;;  %v1769_v52 = vcombine.low %v2302_v28, %v2337_v7  ;;  %v1772_v57 = vcombine.low %v2322_v54, %v843_v41  ;;  %v1076_v47 = vrot.slane %v1074_v46, 4  ;;  %v1770_v58 = vcombine.low %v2346_v22, %v2282_v14 }
  0x83   : > { %1205 = vrot.lane.b32.xlu0 %v1943_v20, %s2023_s5  ;;  %1227 = vrot.lane.b32.xlu1 %v1767_v19, %s2024_s11  ;;  %v1079_v48 = vrot.slane %v1077_v49, 5  ;;  %v1775_v1 = vcombine.low %v2279_v13, %v2272_v10  ;;  %v1083_v60 = vshll.u32 %v844_v53, 16  ;;  %v1773_v17 = vcombine.low %v2269_v9, %v2257_v4 }
  0x84   : > { %v1776_v56 = vcombine.low %v2276_v12, %v845_v2  ;;  %v1774_v15 = vcombine.low %v2260_v5, %v2263_v6  ;;  %v1779_v19 = vcombine.low %v2333_v0, %v2364_v51  ;;  %v1777_v9 = vcombine.low %v2351_v23, %v2376_v3 }
  0x85   : > { %1818 = vmatpush3.bf16.msra.mxu0 %v1956_v42  ;;  %1845 = vmatpush3.bf16.msra.mxu1 %v1956_v42  ;;  %v1080_v16 = vor.u32 %v1079_v48, %v1076_v47  ;;  %v1085_v13 = vrot.slane %v1083_v60, 5  ;;  %v1778_v5 = vcombine.low %v2386_v32, %v2327_v59  ;;  %vm1348_vm11 = vcmask 293888  }
  0x86   : > { %1819 = vmatprep.subr.bf16.mxu0 %v1957_v50  ;;  %1838 = vmatprep.subr.bf16.mxu1 %v1957_v50 }
  0x87   : > { %1223 = vrot.lane.b32.xlu0 %v1765_v33, %s2024_s11  ;;  %1229 = vrot.lane.b32.xlu1 %v1768_v34, %s2024_s11  ;;  %v1081_v10 = vrot.slane %v1080_v16, 4 }
  0x89   : > { %1820 = vmatpush3.bf16.msra.mxu0 %v1957_v50  ;;  %1846 = vmatpush3.bf16.msra.mxu1 %v1957_v50  ;;  %v1086_v4 = vsel %vm2316_vm2, %v1081_v10, %v1085_v13 }
  0x8a   : > { %1821 = vmatprep.subr.bf16.mxu0 %v1958_v55  ;;  %1839 = vmatprep.subr.bf16.mxu1 %v1958_v55  ;;  %v1780_v12 = vcombine.low %v2370_v61, %v1086_v4 }
  0x8b   : > { %1225 = vrot.lane.b32.xlu0 %v1766_v45, %s2024_s11  ;;  %1241 = vrot.lane.b32.xlu1 %v1771_v40, %s2025_s22 }
  0x8d   : > { %1822 = vmatpush3.bf16.msra.mxu0 %v1958_v55  ;;  %1847 = vmatpush3.bf16.msra.mxu1 %v1958_v55 }
  0x8e   : > { %1823 = vmatprep.subr.bf16.mxu0 %v1959_v62  ;;  %1840 = vmatprep.subr.bf16.mxu1 %v1959_v62 }
  0x8f   : > { %1237 = vrot.lane.b32.xlu0 %v1769_v52, %s2025_s22  ;;  %1243 = vrot.lane.b32.xlu1 %v1772_v57, %s2025_s22 }
  0x91   : > { %1824 = vmatpush3.bf16.msra.mxu0 %v1959_v62  ;;  %1848 = vmatpush3.bf16.msra.mxu1 %v1959_v62 }
  0x93   : > { %1239 = vrot.lane.b32.xlu0 %v1770_v58, %s2025_s22  ;;  %1255 = vrot.lane.b32.xlu1 %v1775_v1, %s2026_s28 }
  0x97   : > { %1251 = vrot.lane.b32.xlu0 %v1773_v17, %s2026_s28  ;;  %1257 = vrot.lane.b32.xlu1 %v1776_v56, %s2026_s28 }
  0x9b   : > { %1253 = vrot.lane.b32.xlu0 %v1774_v15, %s2026_s28  ;;  %1268 = vrot.lane.b32.xlu1 %v1779_v19, %s2027_s29 }
  0x9f   : > { %1264 = vrot.lane.b32.xlu0 %v1777_v9, %s2027_s29  ;;  %1270 = vrot.lane.b32.xlu1 %v1780_v12, %s2027_s29 }
  0xa3   : > { %1266 = vrot.lane.b32.xlu0 %v1778_v5, %s2027_s29 }
  0xca   : > { %v1130_v6 = vpop.permute.xlu1 %1129 }
  0xcb   : > { %v1128_v20 = vpop.permute.xlu0 %1127  ;;  %v1278_v58 = vsel %vm1272_vm4, %v1746_v37, %v1130_v6  ;;  %v1781_v6 = vld [vmem:[%s2576_s3] ss:$0 sm:$0xff] }
  0xcc   : > { %v1275_v57 = vsel %vm1272_vm4, %v1745_v38, %v1128_v20 }
  0xce   : > { %v1134_v0 = vpop.permute.xlu1 %1133 }
  0xcf   : > { %v1132_v51 = vpop.permute.xlu0 %1131  ;;  %v1284_v14 = vsel %vm1272_vm4, %v1748_v39, %v1134_v0 }
  0xd0   : > { %v1281_v40 = vsel %vm1272_vm4, %v1747_v29, %v1132_v51 }
  0xd7   : > { %v1152_v44 = vpop.permute.xlu1 %1151 }
  0xd8   : > { %v1291_v41 = vsel %vm1285_vm3, %v1281_v40, %v1152_v44 }
  0xda   : > { %v1148_v63 = vpop.permute.xlu0 %1147 }
  0xdb   : > { %v1287_v29 = vsel %vm1285_vm3, %v1275_v57, %v1148_v63 }
  0xe1   : > { %v1154_v21 = vpop.permute.xlu1 %1153 }
  0xe2   : > { %v1293_v47 = vsel %vm1285_vm3, %v1284_v14, %v1154_v21 }
  0xe5   : > { %v1150_v8 = vpop.permute.xlu0 %1149  ;;  %v1180_v11 = vpop.permute.xlu1 %1179 }
  0xe6   : > { %v1300_v46 = vsel %vm1294_vm5, %v1291_v41, %v1180_v11  ;;  %v1289_v16 = vsel %vm1285_vm3, %v1278_v58, %v1150_v8 }
  0xe9   : > { %v1176_v25 = vpop.permute.xlu0 %1175  ;;  %v1182_v26 = vpop.permute.xlu1 %1181 }
  0xea   : > { %v1296_v53 = vsel %vm1294_vm5, %v1287_v29, %v1176_v25  ;;  %v1302_v24 = vsel %vm1294_vm5, %v1293_v47, %v1182_v26 }
  0xed   : > { %v1178_v23 = vpop.permute.xlu0 %1177  ;;  %v1208_v3 = vpop.permute.xlu1 %1207 }
  0xee   : > { %v1309_v52 = vsel %vm1303_vm6, %v1300_v46, %v1208_v3  ;;  %v1298_v17 = vsel %vm1294_vm5, %v1289_v16, %v1178_v23 }
  0xf1   : > { %v1204_v61 = vpop.permute.xlu0 %1203  ;;  %v1210_v27 = vpop.permute.xlu1 %1209 }
  0xf2   : > { %v1305_v54 = vsel %vm1303_vm6, %v1296_v53, %v1204_v61  ;;  %v1311_v39 = vsel %vm1303_vm6, %v1302_v24, %v1210_v27 }
  0xf5   : > { %v1206_v30 = vpop.permute.xlu0 %1205  ;;  %v1228_v31 = vpop.permute.xlu1 %1227 }
  0xf6   : > { %v1318_v18 = vsel %vm1312_vm7, %v1309_v52, %v1228_v31  ;;  %v1307_v10 = vsel %vm1303_vm6, %v1298_v17, %v1206_v30 }
  0xf9   : > { %v1224_v33 = vpop.permute.xlu0 %1223  ;;  %v1230_v59 = vpop.permute.xlu1 %1229 }
  0xfa   : > { %v1314_v1 = vsel %vm1312_vm7, %v1305_v54, %v1224_v33  ;;  %v1320_v2 = vsel %vm1312_vm7, %v1311_v39, %v1230_v59 }
  0xfd   : > { %v1226_v32 = vpop.permute.xlu0 %1225  ;;  %v1242_v34 = vpop.permute.xlu1 %1241 }
  0xfe   : > { %v1327_v48 = vsel %vm1321_vm8, %v1318_v18, %v1242_v34  ;;  %v1316_v19 = vsel %vm1312_vm7, %v1307_v10, %v1226_v32 }
 0x101   : > { %v1238_v36 = vpop.permute.xlu0 %1237  ;;  %v1244_v35 = vpop.permute.xlu1 %1243 }
 0x102   : > { %v1323_v60 = vsel %vm1321_vm8, %v1314_v1, %v1238_v36  ;;  %v1329_v62 = vsel %vm1321_vm8, %v1320_v2, %v1244_v35 }
 0x105   : > { %v1240_v42 = vpop.permute.xlu0 %1239  ;;  %v1256_v45 = vpop.permute.xlu1 %1255 }
 0x106   : > { %v1336_v28 = vsel %vm1330_vm9, %v1327_v48, %v1256_v45  ;;  %v1325_v4 = vsel %vm1321_vm8, %v1316_v19, %v1240_v42 }
 0x109   : > { %v1252_v49 = vpop.permute.xlu0 %1251  ;;  %v1258_v50 = vpop.permute.xlu1 %1257 }
 0x10a   : > { %v1332_v56 = vsel %vm1330_vm9, %v1323_v60, %v1252_v49  ;;  %v1338_v7 = vsel %vm1330_vm9, %v1329_v62, %v1258_v50 }
 0x10d   : > { %v1254_v38 = vpop.permute.xlu0 %1253  ;;  %v1269_v43 = vpop.permute.xlu1 %1268 }
 0x10e   : > { %v1345_v55 = vsel %vm1339_vm10, %v1336_v28, %v1269_v43  ;;  %v1334_v9 = vsel %vm1330_vm9, %v1325_v4, %v1254_v38 }
 0x10f   : > { %1829 = vmatprep.mubr.msk.bf16.mxu1 %vm1348_vm11, %v1345_v55 }
 0x111   : > { %v1265_v22 = vpop.permute.xlu0 %1264  ;;  %v1271_v37 = vpop.permute.xlu1 %1270 }
 0x112   : > { %v1341_v13 = vsel %vm1339_vm10, %v1332_v56, %v1265_v22  ;;  %v1347_v15 = vsel %vm1339_vm10, %v1338_v7, %v1271_v37 }
 0x113   : > { %1825 = vmatprep.mubr.msk.bf16.mxu0 %vm1348_vm11, %v1341_v13  ;;  %1830 = vmatmul.mubr.msk.bf16.vlgmr.msra.gmra.mrb[0].mxu1 %vm1348_vm11, %v1347_v15 }
 0x115   : > { %v1267_v12 = vpop.permute.xlu0 %1266 }
 0x116   : > { %v1343_v5 = vsel %vm1339_vm10, %v1334_v9, %v1267_v12 }
 0x117   : > { %1826 = vmatmul.mubr.msk.bf16.vlgmr.msra.gmra.mrb[0].mxu0 %vm1348_vm11, %v1343_v5 }
 0x1e6   : > { %v1831_v20 = vpop.f32.mrb[0].mxu1 }
 0x1e7   : > { %v1488_v0 = vadd.f32 %v1831_v20, %v1781_v6  ;;  %v1479_v51 = vpop.f32.mrb[1].mxu1 }
 0x1e8   : > { %v1480_v44 = vadd.f32 %v1781_v6, %v1479_v51  ;;  %v1832_v63 = vpop.f32.mrb[2].mxu1 }
 0x1e9   : > { %1500 = vst.msk [vmem:[%s792_s9 + $0x30] sm:$0xff] %vm1285_vm3, %v1488_v0  ;;  %v1491_v21 = vadd.f32 %v1832_v63, %v1781_v6  ;;  %v1482_v8 = vpop.f32.mrb[3].mxu1 }
 0x1ea   : > { %v1827_v11 = vpop.f32.mrb[0].mxu0  ;;  %1498 = vst.msk [vmem:[%s792_s9 + $0x20] sm:$0xff] %vm1285_vm3, %v1480_v44  ;;  %v1483_v25 = vadd.f32 %v1781_v6, %v1482_v8 }
 0x1eb   : > { %v1472_v26 = vadd.f32 %v1827_v11, %v1781_v6  ;;  %v1463_v23 = vpop.f32.mrb[1].mxu0  ;;  %1501 = vst.msk [vmem:[%s792_s9 + $0x38] sm:$0xff] %vm1285_vm3, %v1491_v21 }
 0x1ec   : > { %v1464_v3 = vadd.f32 %v1781_v6, %v1463_v23  ;;  %v1828_v61 = vpop.f32.mrb[2].mxu0  ;;  %1499 = vst.msk [vmem:[%s792_s9 + $0x28] sm:$0xff] %vm1285_vm3, %v1483_v25 }
 0x1ed   : > { %1496 = vst.msk [vmem:[%s792_s9 + $0x10] sm:$0xff] %vm1285_vm3, %v1472_v26  ;;  %v1475_v27 = vadd.f32 %v1828_v61, %v1781_v6  ;;  %v1466_v30 = vpop.f32.mrb[3].mxu0 }
 0x1ee   : > { %1494 = vst.msk [vmem:[%s792_s9] sm:$0xff] %vm1285_vm3, %v1464_v3  ;;  %v1467_v31 = vadd.f32 %v1781_v6, %v1466_v30 }
 0x1ef   : > { %1497 = vst.msk [vmem:[%s792_s9 + $0x18] sm:$0xff] %vm1285_vm3, %v1475_v27 }
 0x1f0   : > { %1495 = vst.msk [vmem:[%s792_s9 + $0x8] sm:$0xff] %vm1285_vm3, %v1467_v31 }
 0x1f1 PF: > { %s14_s19 = sadd.s32 1, %s2014_s19   ;;  %s2581_s15 = smov %s2002_s16 }
 0x1f2   : > { %p11_p11 = scmp.ge.s32.totalorder %s14_s19, 4   ;;  %s2582_s16 = smov %s2092_s24 }
 0x1f3   : > { %s2583_s17 = smov %s2010_s18  ;;  %s2584_s18 = smov %s2586_s20 }
 0x1f4   :  { %13 = sbr.rel (!%p11_p11) target bundleno = 3 (0x3), region = 224 }

</bundles_post_ra>
